<compile_context>
chip_gen: v7x
topology: tpu7x:2x2x1
jax: 0.10.0
libtpu: 0.0.40
codegen_flags: <defaults>
</compile_context>

<pallas_src>
import functools

import jax
import jax.numpy as jnp
from jax.experimental import pallas as pl
from jax.experimental.pallas import tpu as pltpu


# ----------------------------------------------------------------------------
# In-kernel math helpers
# ----------------------------------------------------------------------------
def _erf(x):
    # Abramowitz & Stegun 7.1.26 rational approximation (|err| < 1.5e-7),
    # matching PyTorch's exact-erf GELU to f32 precision.
    a1, a2, a3, a4, a5 = 0.254829592, -0.284496736, 1.421413741, -1.453152027, 1.061405429
    p = 0.3275911
    s = jnp.where(x >= 0.0, 1.0, -1.0)
    ax = jnp.abs(x)
    d = 1.0 + p * ax
    # approx reciprocal lands on the otherwise-idle EUP slot; one Newton step
    # restores ~f32 precision so the 1e-4 tolerance is unaffected.
    t = pl.reciprocal(d, approx=True)
    t = t * (2.0 - d * t)
    poly = ((((a5 * t + a4) * t + a3) * t + a2) * t + a1) * t
    return s * (1.0 - poly * jnp.exp(-ax * ax))


def _gelu_exact(x):
    return 0.5 * x * (1.0 + _erf(x * 0.7071067811865476))


# ----------------------------------------------------------------------------
# Pallas kernel: one batch element per grid step
# ----------------------------------------------------------------------------
def eac_kernel(x0_ref, ap_ref, adj_ref,
               w1_ref, w2_ref, wfc_ref, b_ref, conv_ref,
               out_ref, *, K, dil, pad, T, H, Y):
    f32 = jnp.float32
    x0 = x0_ref[...]                       # (N, T)  original data.x for this batch
    x1 = x0 + ap_ref[...]                  # (N, T)  + EAC adaptive params (in-kernel)
    adj = adj_ref[...]                     # (N, N)  shared adjacency

    # ---- gcn1 (BatchGCNConv, gcn=False): Linear_n(adj@x) + Linear_s(x), ReLU ----
    # Two dots on static slice views of the packed weight slab (no concat copy).
    ax1 = jnp.dot(adj, x1, preferred_element_type=f32)
    h = (jnp.dot(ax1, w1_ref[:T, :], preferred_element_type=f32)
         + jnp.dot(x1, w1_ref[T:, :], preferred_element_type=f32)
         + b_ref[0:1, :H])
    h = jnp.maximum(h, 0.0)                # (N, H)

    # ---- tcn: Conv1d(in=1, out=1, K, dilation, padding) over the hidden axis,
    #      as a static K-tap shift-and-FMA (roll -> XLU, FMAs -> VPU) ----
    col = jax.lax.broadcasted_iota(jnp.int32, h.shape, 1)
    acc = jnp.full_like(h, conv_ref[K])    # conv bias (SMEM scalar)
    for k in range(K):                     # K is a static Python int -> unrolled
        off = k * dil - pad                # output col j reads input col j + off
        shift = (-off) % H
        tap = pltpu.roll(h, shift, axis=1) if shift != 0 else h
        if off == 0:
            masked = tap
        else:
            valid = (col >= -off) & (col < H - off)   # zero padding at the edges
            masked = jnp.where(valid, tap, 0.0)
        acc = acc + conv_ref[k] * masked
    h2 = acc                               # (N, H)

    # ---- gcn2, same fused two-dot structure ----
    ax2 = jnp.dot(adj, h2, preferred_element_type=f32)
    y = (jnp.dot(ax2, w2_ref[:H, :], preferred_element_type=f32)
         + jnp.dot(h2, w2_ref[H:, :], preferred_element_type=f32)
         + b_ref[1:2, :T])

    # ---- residual with ORIGINAL data.x, exact GELU, fc head ----
    y = y + x0
    g = _gelu_exact(y)
    out = jnp.dot(g, wfc_ref[...], preferred_element_type=f32) + b_ref[2:3, :Y]

    # TODO(synk): F.dropout(p=args.dropout, training=self.training) — eval-mode
    #             (identity) semantics only; training-mode RNG dropout not implemented.
    out_ref[...] = out


# ----------------------------------------------------------------------------
# Wrapper: parameter packing + pallas_call with a batch grid
# ----------------------------------------------------------------------------
def eac_forward(params, x_flat, adj, *, B, N, T, H, Y, K, dil, pad):
    f32 = jnp.float32
    x0 = x_flat.reshape(B, N, T).astype(f32)

    # Batch-invariant adaptive params hoisted to the wrapper: only (N, T) is shipped.
    ap = (params["U"][:N, :] @ params["V"]).astype(f32)

    # Packed GCN weights [W_neighbor ; W_self]; sliced statically inside the kernel.
    w1 = jnp.concatenate([params["W_n1"], params["W_s1"]], axis=0).astype(f32)   # (2T, H)
    w2 = jnp.concatenate([params["W_n2"], params["W_s2"]], axis=0).astype(f32)   # (2H, T)
    wfc = params["W_fc"].astype(f32)                                             # (T, Y)

    # All biases packed into one tiny slab -> one DMA instead of three.
    bmax = max(H, T, Y)
    biases = jnp.zeros((3, bmax), f32)
    biases = biases.at[0, :H].set(params["b_n1"].astype(f32))
    biases = biases.at[1, :T].set(params["b_n2"].astype(f32))
    biases = biases.at[2, :Y].set(params["b_fc"].astype(f32))

    # Conv scalars (K taps + 1 bias) live in SMEM.
    convp = jnp.concatenate([params["conv_w"], params["conv_b"]]).astype(f32)    # (K+1,)

    flops = B * (2 * N * N * T + 4 * N * T * H + 2 * N * H * K
                 + 2 * N * N * H + 4 * N * H * T + 2 * N * T * Y)
    cost = pl.CostEstimate(
        flops=flops,
        transcendentals=2 * B * N * T,                 # exp + reciprocal per GELU element
        bytes_accessed=4 * (x0.size + ap.size + adj.size + w1.size + w2.size
                            + wfc.size + biases.size + convp.size + B * N * Y),
    )

    out = pl.pallas_call(
        functools.partial(eac_kernel, K=K, dil=dil, pad=pad, T=T, H=H, Y=Y),
        grid=(B,),
        out_shape=jax.ShapeDtypeStruct((B, N, Y), jnp.float32),
        in_specs=[
            pl.BlockSpec((pl.Squeezed(), N, T), lambda b: (b, 0, 0)),   # x0  (per batch)
            pl.BlockSpec((N, T), lambda b: (0, 0)),                     # ap  (shared)
            pl.BlockSpec((N, N), lambda b: (0, 0)),                     # adj (shared)
            pl.BlockSpec((2 * T, H), lambda b: (0, 0)),                 # w1
            pl.BlockSpec((2 * H, T), lambda b: (0, 0)),                 # w2
            pl.BlockSpec((T, Y), lambda b: (0, 0)),                     # wfc
            pl.BlockSpec((3, bmax), lambda b: (0, 0)),                  # biases
            pl.BlockSpec(memory_space=pltpu.MemorySpace.SMEM),          # conv scalars
        ],
        out_specs=pl.BlockSpec((pl.Squeezed(), N, Y), lambda b: (b, 0, 0)),
        compiler_params=pltpu.CompilerParams(
            dimension_semantics=("parallel",),    # batch blocks independent (v7x megacore)
            vmem_limit_bytes=32 * 1024 * 1024,
        ),
        cost_estimate=cost,
    )(x0, ap, adj.astype(f32), w1, w2, wfc, biases, convp)

    return out.reshape(B * N, Y)


# ----------------------------------------------------------------------------
# Pure-JAX reference (for correctness check)
# ----------------------------------------------------------------------------
def eac_reference(params, x_flat, adj, *, B, N, T, H, Y, K, dil, pad):
    x0 = x_flat.reshape(B, N, T)
    ap = params["U"][:N, :] @ params["V"]
    x1 = x0 + ap[None]
    ax = jnp.einsum("ij,bjt->bit", adj, x1)
    h = jax.nn.relu(ax @ params["W_n1"] + params["b_n1"] + x1 @ params["W_s1"])
    hf = h.reshape(-1, H)
    hp = jnp.pad(hf, ((0, 0), (pad, pad)))
    h2 = sum(params["conv_w"][k] * hp[:, k * dil: k * dil + H] for k in range(K))
    h2 = (h2 + params["conv_b"][0]).reshape(B, N, H)
    ax2 = jnp.einsum("ij,bjh->bih", adj, h2)
    y = ax2 @ params["W_n2"] + params["b_n2"] + h2 @ params["W_s2"]
    y = y + x0
    g = jax.nn.gelu(y, approximate=False)
    out = g @ params["W_fc"] + params["b_fc"]
    return out.reshape(B * N, Y)


# ----------------------------------------------------------------------------
if __name__ == "__main__":
    # Model hyper-params (small, consistent with the module's 'st' + 'conv' path)
    B, N = 2, 16
    T = 16            # gcn in_channel == gcn out_channel (residual with data.x)
    H = 32            # gcn hidden_channel
    Y = 8             # y_len
    RANK = 8
    BASE_NODES = 24   # base_node_size >= N (forward slices U[:N])
    K, DIL = 3, 1     # static conv config (kernel_size, dilation)
    PAD = (K - 1) * DIL // 2

    key = jax.random.PRNGKey(0)
    ks = jax.random.split(key, 16)
    u = lambda k, shape, b: jax.random.uniform(k, shape, jnp.float32, -b, b)

    params = {
        "U": u(ks[0], (BASE_NODES, RANK), 0.1),
        "V": u(ks[1], (RANK, T), 0.1),
        # gcn1: Linear(T->H, bias) for neighbors, Linear(T->H, no bias) for self
        "W_n1": u(ks[2], (T, H), 1.0 / jnp.sqrt(T)),
        "b_n1": u(ks[3], (H,), 1.0 / jnp.sqrt(T)),
        "W_s1": u(ks[4], (T, H), 1.0 / jnp.sqrt(T)),
        # tcn: Conv1d(1, 1, K, dilation=DIL, padding=PAD)
        "conv_w": u(ks[5], (K,), 1.0 / jnp.sqrt(K)),
        "conv_b": u(ks[6], (1,), 1.0 / jnp.sqrt(K)),
        # gcn2: Linear(H->T, bias) + Linear(H->T, no bias)
        "W_n2": u(ks[7], (H, T), 1.0 / jnp.sqrt(H)),
        "b_n2": u(ks[8], (T,), 1.0 / jnp.sqrt(H)),
        "W_s2": u(ks[9], (H, T), 1.0 / jnp.sqrt(H)),
        # fc: Linear(T -> Y)
        "W_fc": u(ks[10], (T, Y), 1.0 / jnp.sqrt(T)),
        "b_fc": u(ks[11], (Y,), 1.0 / jnp.sqrt(T)),
    }

    # Inputs: data.x is (B*N, T), adj is (N, N)
    x_flat = jax.random.normal(ks[12], (B * N, T), jnp.float32)
    adj = jax.random.uniform(ks[13], (N, N), jnp.float32)
    adj = adj / jnp.sum(adj, axis=1, keepdims=True)   # row-normalized adjacency

    fwd = jax.jit(functools.partial(eac_forward, B=B, N=N, T=T, H=H, Y=Y,
                                    K=K, dil=DIL, pad=PAD))
    out = fwd(params, x_flat, adj)
    jax.block_until_ready(out)

    ref = eac_reference(params, x_flat, adj, B=B, N=N, T=T, H=H, Y=Y,
                        K=K, dil=DIL, pad=PAD)
    assert out.shape == (B * N, Y)
    assert jnp.allclose(out, ref, atol=1e-4, rtol=1e-4), (
        float(jnp.max(jnp.abs(out - ref))))

    print("KERNEL_OK")
</pallas_src>

<mosaic_0001>
module attributes {stable_mosaic.version = 11 : i64} {
  func.func @eac_kernel(%arg0: i32, %arg1: memref<1x16x16xf32, #tpu.memory_space<vmem>>, %arg2: memref<16x16xf32, #tpu.memory_space<vmem>>, %arg3: memref<16x16xf32, #tpu.memory_space<vmem>>, %arg4: memref<32x32xf32, #tpu.memory_space<vmem>>, %arg5: memref<64x16xf32, #tpu.memory_space<vmem>>, %arg6: memref<16x8xf32, #tpu.memory_space<vmem>>, %arg7: memref<3x32xf32, #tpu.memory_space<vmem>>, %arg8: memref<4xf32, #tpu.memory_space<smem>>, %arg9: memref<1x16x8xf32, #tpu.memory_space<vmem>>) attributes {dimension_semantics = [#tpu.dimension_semantics<parallel>], iteration_bounds = array<i64: 2>, scalar_prefetch = 0 : i64, scratch_operands = 0 : i64, tpu.core_type = #tpu.core_type<tc>, window_params = [{transform_indices = @transform_0, window_bounds = array<i64: 1, 16, 16>}, {pipeline_mode = #tpu.pipeline_mode<synchronous>, transform_indices = @transform_1, window_bounds = array<i64: 16, 16>}, {pipeline_mode = #tpu.pipeline_mode<synchronous>, transform_indices = @transform_2, window_bounds = array<i64: 16, 16>}, {pipeline_mode = #tpu.pipeline_mode<synchronous>, transform_indices = @transform_3, window_bounds = array<i64: 32, 32>}, {pipeline_mode = #tpu.pipeline_mode<synchronous>, transform_indices = @transform_4, window_bounds = array<i64: 64, 16>}, {pipeline_mode = #tpu.pipeline_mode<synchronous>, transform_indices = @transform_5, window_bounds = array<i64: 16, 8>}, {pipeline_mode = #tpu.pipeline_mode<synchronous>, transform_indices = @transform_6, window_bounds = array<i64: 3, 32>}, {transform_indices = @transform_7, window_bounds = array<i64: 4>}, {transform_indices = @transform_8, window_bounds = array<i64: 1, 16, 8>}]} {
    %c0 = arith.constant 0 : index
    %c0_0 = arith.constant 0 : index
    %c0_1 = arith.constant 0 : index
    %0 = vector.load %arg1[%c0, %c0_0, %c0_1] : memref<1x16x16xf32, #tpu.memory_space<vmem>>, vector<1x16x16xf32>
    %1 = vector.shape_cast %0 : vector<1x16x16xf32> to vector<16x16xf32>
    %c0_2 = arith.constant 0 : index
    %c0_3 = arith.constant 0 : index
    %2 = vector.load %arg2[%c0_2, %c0_3] : memref<16x16xf32, #tpu.memory_space<vmem>>, vector<16x16xf32>
    %3 = arith.addf %1, %2 : vector<16x16xf32>
    %c0_4 = arith.constant 0 : index
    %c0_5 = arith.constant 0 : index
    %4 = vector.load %arg3[%c0_4, %c0_5] : memref<16x16xf32, #tpu.memory_space<vmem>>, vector<16x16xf32>
    %cst = arith.constant dense<0.000000e+00> : vector<16x16xf32>
    %5 = tpu.matmul %4, %3, %cst {dimension_numbers = #tpu.dot_dimension_numbers<[1], [0], [0], [1], [0, 0, 1, 1], [], []>} : vector<16x16xf32>, vector<16x16xf32>, vector<16x16xf32> -> vector<16x16xf32>
    %c0_6 = arith.constant 0 : index
    %c0_7 = arith.constant 0 : index
    %6 = vector.load %arg4[%c0_6, %c0_7] : memref<32x32xf32, #tpu.memory_space<vmem>>, vector<16x32xf32>
    %cst_8 = arith.constant dense<0.000000e+00> : vector<16x32xf32>
    %7 = tpu.matmul %5, %6, %cst_8 {dimension_numbers = #tpu.dot_dimension_numbers<[1], [0], [0], [1], [0, 0, 1, 1], [], []>} : vector<16x16xf32>, vector<16x32xf32>, vector<16x32xf32> -> vector<16x32xf32>
    %c16 = arith.constant 16 : index
    %c0_9 = arith.constant 0 : index
    %8 = vector.load %arg4[%c16, %c0_9] : memref<32x32xf32, #tpu.memory_space<vmem>>, vector<16x32xf32>
    %cst_10 = arith.constant dense<0.000000e+00> : vector<16x32xf32>
    %9 = tpu.matmul %3, %8, %cst_10 {dimension_numbers = #tpu.dot_dimension_numbers<[1], [0], [0], [1], [0, 0, 1, 1], [], []>} : vector<16x16xf32>, vector<16x32xf32>, vector<16x32xf32> -> vector<16x32xf32>
    %10 = arith.addf %7, %9 : vector<16x32xf32>
    %c0_11 = arith.constant 0 : index
    %c0_12 = arith.constant 0 : index
    %11 = vector.load %arg7[%c0_11, %c0_12] : memref<3x32xf32, #tpu.memory_space<vmem>>, vector<1x32xf32>
    %12 = vector.broadcast %11 : vector<1x32xf32> to vector<16x32xf32>
    %13 = arith.addf %10, %12 : vector<16x32xf32>
    %cst_13 = arith.constant 0.000000e+00 : f32
    %14 = vector.broadcast %cst_13 : f32 to vector<16x32xf32>
    %15 = arith.maximumf %13, %14 : vector<16x32xf32>
    %16 = tpu.iota {dimensions = array<i32: 1>} : vector<16x32xi32>
    %c3 = arith.constant 3 : index
    %17 = memref.load %arg8[%c3] : memref<4xf32, #tpu.memory_space<smem>>
    %18 = vector.broadcast %17 : f32 to vector<16x32xf32>
    %c1_i32 = arith.constant 1 : i32
    %19 = tpu.dynamic_rotate %15 by %c1_i32 dim 1 : vector<16x32xf32>, i32 -> vector<16x32xf32>
    %c1_i32_14 = arith.constant 1 : i32
    %20 = vector.broadcast %c1_i32_14 : i32 to vector<16x32xi32>
    %21 = arith.cmpi sge, %16, %20 : vector<16x32xi32>
    %c33_i32 = arith.constant 33 : i32
    %22 = vector.broadcast %c33_i32 : i32 to vector<16x32xi32>
    %23 = arith.cmpi slt, %16, %22 : vector<16x32xi32>
    %24 = arith.andi %21, %23 : vector<16x32xi1>
    %cst_15 = arith.constant 0.000000e+00 : f32
    %25 = vector.broadcast %cst_15 : f32 to vector<16x32xf32>
    %26 = arith.select %24, %19, %25 : vector<16x32xi1>, vector<16x32xf32>
    %c0_16 = arith.constant 0 : index
    %27 = memref.load %arg8[%c0_16] : memref<4xf32, #tpu.memory_space<smem>>
    %28 = vector.broadcast %27 : f32 to vector<16x32xf32>
    %29 = arith.mulf %28, %26 : vector<16x32xf32>
    %30 = arith.addf %18, %29 : vector<16x32xf32>
    %c1 = arith.constant 1 : index
    %31 = memref.load %arg8[%c1] : memref<4xf32, #tpu.memory_space<smem>>
    %32 = vector.broadcast %31 : f32 to vector<16x32xf32>
    %33 = arith.mulf %32, %15 : vector<16x32xf32>
    %34 = arith.addf %30, %33 : vector<16x32xf32>
    %c31_i32 = arith.constant 31 : i32
    %35 = tpu.dynamic_rotate %15 by %c31_i32 dim 1 : vector<16x32xf32>, i32 -> vector<16x32xf32>
    %c-1_i32 = arith.constant -1 : i32
    %36 = vector.broadcast %c-1_i32 : i32 to vector<16x32xi32>
    %37 = arith.cmpi sge, %16, %36 : vector<16x32xi32>
    %c31_i32_17 = arith.constant 31 : i32
    %38 = vector.broadcast %c31_i32_17 : i32 to vector<16x32xi32>
    %39 = arith.cmpi slt, %16, %38 : vector<16x32xi32>
    %40 = arith.andi %37, %39 : vector<16x32xi1>
    %cst_18 = arith.constant 0.000000e+00 : f32
    %41 = vector.broadcast %cst_18 : f32 to vector<16x32xf32>
    %42 = arith.select %40, %35, %41 : vector<16x32xi1>, vector<16x32xf32>
    %c2 = arith.constant 2 : index
    %43 = memref.load %arg8[%c2] : memref<4xf32, #tpu.memory_space<smem>>
    %44 = vector.broadcast %43 : f32 to vector<16x32xf32>
    %45 = arith.mulf %44, %42 : vector<16x32xf32>
    %46 = arith.addf %34, %45 : vector<16x32xf32>
    %cst_19 = arith.constant dense<0.000000e+00> : vector<16x32xf32>
    %47 = tpu.matmul %4, %46, %cst_19 {dimension_numbers = #tpu.dot_dimension_numbers<[1], [0], [0], [1], [0, 0, 1, 1], [], []>} : vector<16x16xf32>, vector<16x32xf32>, vector<16x32xf32> -> vector<16x32xf32>
    %c0_20 = arith.constant 0 : index
    %c0_21 = arith.constant 0 : index
    %48 = vector.load %arg5[%c0_20, %c0_21] : memref<64x16xf32, #tpu.memory_space<vmem>>, vector<32x16xf32>
    %cst_22 = arith.constant dense<0.000000e+00> : vector<16x16xf32>
    %49 = tpu.matmul %47, %48, %cst_22 {dimension_numbers = #tpu.dot_dimension_numbers<[1], [0], [0], [1], [0, 0, 1, 1], [], []>} : vector<16x32xf32>, vector<32x16xf32>, vector<16x16xf32> -> vector<16x16xf32>
    %c32 = arith.constant 32 : index
    %c0_23 = arith.constant 0 : index
    %50 = vector.load %arg5[%c32, %c0_23] : memref<64x16xf32, #tpu.memory_space<vmem>>, vector<32x16xf32>
    %cst_24 = arith.constant dense<0.000000e+00> : vector<16x16xf32>
    %51 = tpu.matmul %46, %50, %cst_24 {dimension_numbers = #tpu.dot_dimension_numbers<[1], [0], [0], [1], [0, 0, 1, 1], [], []>} : vector<16x32xf32>, vector<32x16xf32>, vector<16x16xf32> -> vector<16x16xf32>
    %52 = arith.addf %49, %51 : vector<16x16xf32>
    %c1_25 = arith.constant 1 : index
    %c0_26 = arith.constant 0 : index
    %53 = vector.load %arg7[%c1_25, %c0_26] : memref<3x32xf32, #tpu.memory_space<vmem>>, vector<1x16xf32>
    %54 = vector.broadcast %53 : vector<1x16xf32> to vector<16x16xf32>
    %55 = arith.addf %52, %54 : vector<16x16xf32>
    %56 = arith.addf %55, %1 : vector<16x16xf32>
    %cst_27 = arith.constant 5.000000e-01 : f32
    %57 = vector.broadcast %cst_27 : f32 to vector<16x16xf32>
    %58 = arith.mulf %57, %56 : vector<16x16xf32>
    %cst_28 = arith.constant 0.707106769 : f32
    %59 = vector.broadcast %cst_28 : f32 to vector<16x16xf32>
    %60 = arith.mulf %56, %59 : vector<16x16xf32>
    %cst_29 = arith.constant 0.000000e+00 : f32
    %61 = vector.broadcast %cst_29 : f32 to vector<16x16xf32>
    %62 = arith.cmpf oge, %60, %61 : vector<16x16xf32>
    %cst_30 = arith.constant 1.000000e+00 : f32
    %cst_31 = arith.constant -1.000000e+00 : f32
    %63 = vector.broadcast %cst_30 : f32 to vector<16x16xf32>
    %64 = vector.broadcast %cst_31 : f32 to vector<16x16xf32>
    %65 = arith.select %62, %63, %64 : vector<16x16xi1>, vector<16x16xf32>
    %66 = math.absf %60 : vector<16x16xf32>
    %cst_32 = arith.constant 0.327591091 : f32
    %67 = vector.broadcast %cst_32 : f32 to vector<16x16xf32>
    %68 = arith.mulf %67, %66 : vector<16x16xf32>
    %cst_33 = arith.constant 1.000000e+00 : f32
    %69 = vector.broadcast %cst_33 : f32 to vector<16x16xf32>
    %70 = arith.addf %69, %68 : vector<16x16xf32>
    %71 = tpu.reciprocal %70 {approx = true} : vector<16x16xf32> -> vector<16x16xf32>
    %72 = arith.mulf %70, %71 : vector<16x16xf32>
    %cst_34 = arith.constant 2.000000e+00 : f32
    %73 = vector.broadcast %cst_34 : f32 to vector<16x16xf32>
    %74 = arith.subf %73, %72 : vector<16x16xf32>
    %75 = arith.mulf %71, %74 : vector<16x16xf32>
    %cst_35 = arith.constant 1.06140542 : f32
    %76 = vector.broadcast %cst_35 : f32 to vector<16x16xf32>
    %77 = arith.mulf %76, %75 : vector<16x16xf32>
    %cst_36 = arith.constant -1.45315206 : f32
    %78 = vector.broadcast %cst_36 : f32 to vector<16x16xf32>
    %79 = arith.addf %77, %78 : vector<16x16xf32>
    %80 = arith.mulf %79, %75 : vector<16x16xf32>
    %cst_37 = arith.constant 1.42141378 : f32
    %81 = vector.broadcast %cst_37 : f32 to vector<16x16xf32>
    %82 = arith.addf %80, %81 : vector<16x16xf32>
    %83 = arith.mulf %82, %75 : vector<16x16xf32>
    %cst_38 = arith.constant -0.284496725 : f32
    %84 = vector.broadcast %cst_38 : f32 to vector<16x16xf32>
    %85 = arith.addf %83, %84 : vector<16x16xf32>
    %86 = arith.mulf %85, %75 : vector<16x16xf32>
    %cst_39 = arith.constant 0.254829586 : f32
    %87 = vector.broadcast %cst_39 : f32 to vector<16x16xf32>
    %88 = arith.addf %86, %87 : vector<16x16xf32>
    %89 = arith.mulf %88, %75 : vector<16x16xf32>
    %cst_40 = arith.constant 0.000000e+00 : f32
    %90 = vector.broadcast %cst_40 : f32 to vector<16x16xf32>
    %91 = arith.subf %90, %66 : vector<16x16xf32>
    %92 = arith.mulf %91, %66 : vector<16x16xf32>
    %93 = math.exp %92 : vector<16x16xf32>
    %94 = arith.mulf %89, %93 : vector<16x16xf32>
    %cst_41 = arith.constant 1.000000e+00 : f32
    %95 = vector.broadcast %cst_41 : f32 to vector<16x16xf32>
    %96 = arith.subf %95, %94 : vector<16x16xf32>
    %97 = arith.mulf %65, %96 : vector<16x16xf32>
    %cst_42 = arith.constant 1.000000e+00 : f32
    %98 = vector.broadcast %cst_42 : f32 to vector<16x16xf32>
    %99 = arith.addf %98, %97 : vector<16x16xf32>
    %100 = arith.mulf %58, %99 : vector<16x16xf32>
    %c0_43 = arith.constant 0 : index
    %c0_44 = arith.constant 0 : index
    %101 = vector.load %arg6[%c0_43, %c0_44] : memref<16x8xf32, #tpu.memory_space<vmem>>, vector<16x8xf32>
    %cst_45 = arith.constant dense<0.000000e+00> : vector<16x8xf32>
    %102 = tpu.matmul %100, %101, %cst_45 {dimension_numbers = #tpu.dot_dimension_numbers<[1], [0], [0], [1], [0, 0, 1, 1], [], []>} : vector<16x16xf32>, vector<16x8xf32>, vector<16x8xf32> -> vector<16x8xf32>
    %c2_46 = arith.constant 2 : index
    %c0_47 = arith.constant 0 : index
    %103 = vector.load %arg7[%c2_46, %c0_47] : memref<3x32xf32, #tpu.memory_space<vmem>>, vector<1x8xf32>
    %104 = vector.broadcast %103 : vector<1x8xf32> to vector<16x8xf32>
    %105 = arith.addf %102, %104 : vector<16x8xf32>
    %c0_48 = arith.constant 0 : index
    %c0_49 = arith.constant 0 : index
    %c0_50 = arith.constant 0 : index
    %106 = vector.load %arg9[%c0_48, %c0_49, %c0_50] : memref<1x16x8xf32, #tpu.memory_space<vmem>>, vector<1x16x8xf32>
    %107 = vector.shape_cast %106 : vector<1x16x8xf32> to vector<16x8xf32>
    %108 = vector.shape_cast %105 : vector<16x8xf32> to vector<1x16x8xf32>
    tpu.vector_store %arg9[%c0_48, %c0_49, %c0_50], %108 {strides = array<i32>} : memref<1x16x8xf32, #tpu.memory_space<vmem>>, vector<1x16x8xf32>,
    return
  }
  func.func @transform_0(%arg0: i32) -> (i32, i32, i32) {
    %c0_i32 = arith.constant 0 : i32
    %c0_i32_0 = arith.constant 0 : i32
    %c0_i32_1 = arith.constant 0 : i32
    return %arg0, %c0_i32, %c0_i32_0 : i32, i32, i32
  }
  func.func @transform_1(%arg0: i32) -> (i32, i32) {
    %c0_i32 = arith.constant 0 : i32
    %c0_i32_0 = arith.constant 0 : i32
    %c0_i32_1 = arith.constant 0 : i32
    return %c0_i32, %c0_i32_0 : i32, i32
  }
  func.func @transform_2(%arg0: i32) -> (i32, i32) {
    %c0_i32 = arith.constant 0 : i32
    %c0_i32_0 = arith.constant 0 : i32
    %c0_i32_1 = arith.constant 0 : i32
    return %c0_i32, %c0_i32_0 : i32, i32
  }
  func.func @transform_3(%arg0: i32) -> (i32, i32) {
    %c0_i32 = arith.constant 0 : i32
    %c0_i32_0 = arith.constant 0 : i32
    %c0_i32_1 = arith.constant 0 : i32
    return %c0_i32, %c0_i32_0 : i32, i32
  }
  func.func @transform_4(%arg0: i32) -> (i32, i32) {
    %c0_i32 = arith.constant 0 : i32
    %c0_i32_0 = arith.constant 0 : i32
    %c0_i32_1 = arith.constant 0 : i32
    return %c0_i32, %c0_i32_0 : i32, i32
  }
  func.func @transform_5(%arg0: i32) -> (i32, i32) {
    %c0_i32 = arith.constant 0 : i32
    %c0_i32_0 = arith.constant 0 : i32
    %c0_i32_1 = arith.constant 0 : i32
    return %c0_i32, %c0_i32_0 : i32, i32
  }
  func.func @transform_6(%arg0: i32) -> (i32, i32) {
    %c0_i32 = arith.constant 0 : i32
    %c0_i32_0 = arith.constant 0 : i32
    %c0_i32_1 = arith.constant 0 : i32
    return %c0_i32, %c0_i32_0 : i32, i32
  }
  func.func @transform_7(%arg0: i32) -> i32 {
    %c0_i32 = arith.constant 0 : i32
    %c0_i32_0 = arith.constant 0 : i32
    return %c0_i32 : i32
  }
  func.func @transform_8(%arg0: i32) -> (i32, i32, i32) {
    %c0_i32 = arith.constant 0 : i32
    %c0_i32_0 = arith.constant 0 : i32
    %c0_i32_1 = arith.constant 0 : i32
    return %arg0, %c0_i32, %c0_i32_0 : i32, i32, i32
  }
}

</mosaic_0001>

<bundles_post_ra>
// kernel: eac_forward.1
= control target key start
LH: loop header
LB: loop body
LE: loop exit
PB: predicated region body
PF: predicated region fallthrough
CT: control target
= control target key end

     0   :  { %13 = vsyncpa [#allocation3], 0  ;;  %s1387_s27 = smov 0   ;;  %s1522_s0 = inlined_call_operand.vmem [shape: f32[2,16,16], index: 0, kind: input, shape index: {}]   ;;  %s1523_s1 = inlined_call_operand.vmem [shape: f32[16,16], index: 1, kind: input, shape index: {}]   ;;  %s1524_s2 = inlined_call_operand.vmem [shape: f32[16,16], index: 2, kind: input, shape index: {}]   ;;  %s1525_s3 = inlined_call_operand.vmem [shape: f32[32,32], index: 3, kind: input, shape index: {}]   ;;  %s1526_s4 = inlined_call_operand.vmem [shape: f32[64,16], index: 4, kind: input, shape index: {}]   ;;  %s1527_s5 = inlined_call_operand.vmem [shape: f32[16,8], index: 5, kind: input, shape index: {}]   ;;  %s1528_s6 = inlined_call_operand.vmem [shape: f32[3,32], index: 6, kind: input, shape index: {}]   ;;  %s1529_s7 = inlined_call_operand.vmem [shape: f32[4], index: 7, kind: input, shape index: {}]   ;;  %s1530_s8 = inlined_call_operand.vmem [shape: f32[2,16,8], index: 8, kind: output, shape index: {}]  }
   0x1 LB: > { %s1393_s28 = sadd.s32 4294967295, %s1335_s27   ;;  %p1117_p0 = scmp.ge.s32.totalorder %s1335_s27, 1  ;;  %s1335_s27 = sphi %s1387_s27, %s19_s27  }
   0x2   : > { %p223_p1 = scmp.lt.s32.totalorder %s1335_s27, 3  ;;  %s254_s9 = sshll.u32 %s1529_s7, 4  ;;  %s255_s9 = int_to_ptr.vmem [resolvable:$true] %s254_s9 }
   0x3   : > { %p1287_p3 = scmp.eq.s32.totalorder %s1393_s28, 0  ;;  %s1310_s11 = scalar_lea.vmem %s255_s9, 16 }
   0x4   : > { %p1400_p2 = pnand %p1117_p0, %p223_p1  ;;  %p1311_p6 = scmp.ne.s32.totalorder %s255_s9, %s1310_s11 }
   0x5   : > { %p1318_p10 = scmp.lt.s32.totalorder %s255_s9, %s255_s9  ;;  %p1319_p11 = scmp.lt.s32.totalorder %s1310_s11, %s1310_s11 }
   0x6   : > { %p1283_p4 = pneg %p1400_p2 }
   0x7   : > { %p1320_p12 = por %p1319_p11, %p1318_p10 }
   0x8   : > { %p1284_p5 = pnand %p1287_p3, %p1283_p4 }
   0xa   : > { %p1312_p7 = pneg %p1284_p5 }
   0xc   : > { %p1313_p8 = pnand %p1312_p7, %p1311_p6 }
   0xe   : > { %p1314_p9 = pneg %p1313_p8 }
  0x10   : > { %p1321_p13 = pnand %p1320_p12, %p1314_p9 }
  0x12   : > { %1324 = shalt.err (!%p1321_p13)
}
  0x13   : > { %s1337_s12 = smov [#allocation2]   ;;  %275 = sbr.rel (%p1400_p2) target bundleno = 1541 (0x605), region = 52 }
  0x14   : > { %1286 = dma.vmem_to_smem (!%p1284_p5), %s255_s9, 16, %s1337_s12, [#allocation3]  }
  0x1a   : > { %1330 = dma.done.wait (%p1287_p3), [#allocation3], 16  }
  0x1b   : > { %1332 = vsyncadd (%p1287_p3), [#allocation3], 4294967280 }
  0x1c   : > { %281 = sfence }
  0x1d   : > { %p310_p0 = scmp.lt.s32.totalorder %s1393_s28, 1  ;;  %v326_v0 = vld [vmem:[%s1524_s2] sm:$0xff]  ;;  %vm328_vm0 = vcmask 130048   ;;  %v323_v2 = vld [vmem:[%s1523_s1 + $0x8] sm:$0xff]  ;;  %v412_v3 = vld [vmem:[%s1525_s3 + $0x10] sm:$0xff]  ;;  %s1338_s16 = smov 32   ;;  %v585_v32 = vlaneseq }
  0x1e   : > { %1186 = vmatprep.mubr.msk.f32.mxu1 %vm328_vm0, %v326_v0  ;;  %1207 = vmatprep.mubr.msk.f32.mxu0 %vm328_vm0, %v326_v0  ;;  %v322_v1 = vld [vmem:[%s1523_s1] sm:$0xff]  ;;  %v413_v6 = vld [vmem:[%s1525_s3 + $0x18] sm:$0xff]  ;;  %v411_v12 = vld [vmem:[%s1525_s3 + $0x8] sm:$0xff]  ;;  %vm589_vm1 = vcmask 1047808   ;;  %s1339_s17 = smov 97   ;;  %s1340_s18 = smov 127  }
  0x1f   : > { %s1533_s28 = smov (!%p310_p0, %s1393_s28), 1  ;;  %v1243_v10 = vpack.c.bf16 %v413_v6, %v412_v3  ;;  %v410_v11 = vld [vmem:[%s1525_s3] sm:$0xff]  ;;  %v1457_v13 = vld [vmem:[%s1524_s2 + $0x8] sm:$0xff]  ;;  %v586_v33 = vand.u32 127, %v585_v32  ;;  %s615_s19 = sld [smem:[#allocation2]]  ;;  %v725_v62 = vld [vmem:[%s1526_s4 + $0x30] sm:$0xff] }
  0x20   : > { %s1148_s15 = sshll.u32 %s1533_s28, 4  ;;  %v1247_v14 = vpack.c.bf16 %v411_v12, %v410_v11  ;;  %v1132_v17 = vld [vmem:[%s1528_s6] ss:$0 sm:$0xff]  ;;  %s1133_s20 = sld [smem:[#allocation2 + $0x3]]  ;;  %v724_v57 = vld [vmem:[%s1526_s4 + $0x28] sm:$0xff]  ;;  %v726_v63 = vld [vmem:[%s1526_s4 + $0x38] sm:$0xff] }
  0x21   : > { %s314_s22 = scalar_lea.vmem %s1522_s0, %s1148_s15  ;;  %vm602_vm2 = vcmp.ge.s32.totalorder %v586_v33, 1  ;;  %vm603_vm3 = vcmp.lt.s32.totalorder %v586_v33, 33  ;;  %s1134_s21 = sld [smem:[#allocation2 + $0x1]]  ;;  %vm628_vm5 = vcmp.lt.s32.totalorder %v586_v33, 31  ;;  %v723_v56 = vld [vmem:[%s1526_s4 + $0x20] sm:$0xff]  ;;  %vm727_vm6 = vcmask 261120  }
  0x22   : > { %v1439_v4 = vld [vmem:[%s314_s22] sm:$0xff]  ;;  %v1441_v5 = vld [vmem:[%s314_s22 + $0x8] sm:$0xff]  ;;  %s1135_s22 = sld [smem:[#allocation2 + $0x2]]  ;;  %vm604_vm4 = vmand %vm602_vm2, %vm603_vm3  ;;  %v1255_v61 = vpack.c.bf16 %v724_v57, %v723_v56  ;;  %v1259_v0 = vpack.c.bf16 %v726_v63, %v725_v62  ;;  %s319_s10 = scalar_lea.vmem %s1530_s8, %s1148_s15  ;;  %vm1045_vm9 = vcmask 64512  }
  0x23   : > { %v324_v7 = vadd.f32 %v322_v1, %v1439_v4  ;;  %v325_v8 = vadd.f32 %v323_v2, %v1441_v5  ;;  %v719_v1 = vld [vmem:[%s1526_s4] sm:$0xff]  ;;  %v720_v2 = vld [vmem:[%s1526_s4 + $0x8] sm:$0xff]  ;;  %v721_v6 = vld [vmem:[%s1526_s4 + $0x10] sm:$0xff] }
  0x24   : > { %v1263_v3 = vpack.c.bf16 %v720_v2, %v719_v1  ;;  %v957_v11 = vld [vmem:[%s1527_s5] sm:$0xff]  ;;  %v958_v12 = vld [vmem:[%s1527_s5 + $0x8] sm:$0xff] }
  0x25   : > { %v1239_v9 = vpack.c.bf16 %v325_v8, %v324_v7  ;;  %v616_v34 = vstv %s615_s19 }
  0x26   : > { %v588_v36 = vstv %s1133_s20 }
  0x27   : > { %1240 = vmatprep.subr.bf16.mxu1 %v1239_v9  ;;  %v622_v39 = vstv %s1134_s21 }
  0x28   : > { %1242 = vmatpush3.bf16.msra.mxu1 %v1239_v9  ;;  %v639_v44 = vstv %s1135_s22 }
  0x29   : > { %1244 = vmatprep.subr.bf16.mxu1 %v1243_v10 }
  0x2b   : > { %1187 = vmatmul.mubr.msk.f32.vlgmr.msra.gmra.mrb[0].mxu1 %vm328_vm0, %v1457_v13 }
  0x2c   : > { %1246 = vmatpush3.bf16.msra.mxu1 %v1243_v10  ;;  %1193 = vmatprep.mubr.msk.f32.mxu1 %vm328_vm0, %v324_v7  ;;  %v722_v7 = vld [vmem:[%s1526_s4 + $0x18] sm:$0xff] }
  0x2d   : > { %1248 = vmatprep.subr.bf16.mxu1 %v1247_v14 }
  0x2f   : > { %1194 = vmatmul.mubr.msk.f32.vlgmr.msra.gmra.mrb[2].mxu1 %vm328_vm0, %v325_v8  ;;  %v1267_v8 = vpack.c.bf16 %v722_v7, %v721_v6 }
  0x30   : > { %1250 = vmatpush3.bf16.msra.mxu1 %v1247_v14  ;;  %v1142_v14 = vld [vmem:[%s1528_s6 + $0x1] ss:$0 sm:$0xff] }
  0xfe   : > { %v1188_v15 = vpop.f32.mrb[0].mxu1 }
  0xff   : > { %v401_v16 = vpop.f32.mrb[1].mxu1 }
 0x100   : > { %1200 = vmatprep.mubr.msk.f32.mxu1 %vm328_vm0, %v401_v16 }
 0x101   : > { %1201 = vmatmul.mubr.msk.f32.vlgmr.msra.gmra.mrb[2].mxu1 %vm328_vm0, %v1188_v15 }
 0x1d4   : > { %v1202_v18 = vpop.f32.mrb[2].mxu1 }
 0x1d5   : > { %v567_v19 = vpop.f32.mrb[3].mxu1  ;;  %v582_v21 = vadd.f32 %v1202_v18, %v1132_v17 }
 0x1d6   : > { %v581_v20 = vadd.f32 %v1132_v17, %v567_v19 }
 0x1d7   : > { %v584_v23 = vmax.f32 %v582_v21, 0.0 }
 0x1d8   : > { %v583_v22 = vmax.f32 %v581_v20, 0.0 }
 0x1d9   : > { %v624_v51 = vmul.f32 %v622_v39, %v584_v23 }
 0x1da   : > { %590 = vrot.lane.b32.xlu0 %v583_v22, %s1338_s16  ;;  %v623_v47 = vmul.f32 %v622_v39, %v583_v22 }
 0x1de   : > { %593 = vrot.lane.b32.xlu0 %v584_v23, %s1338_s16 }
 0x24c   : > { %v591_v24 = vpop.permute.xlu0 %590 }
 0x24d   : > { %v592_v25 = vsel %vm589_vm1, %v591_v24, %v583_v22 }
 0x24e   : > { %596 = vrot.lane.b32.xlu1 %v592_v25, %s1338_s16 }
 0x250   : > { %v594_v26 = vpop.permute.xlu0 %593 }
 0x251   : > { %v595_v27 = vsel %vm589_vm1, %v594_v26, %v584_v23 }
 0x252   : > { %598 = vrot.lane.b32.xlu1 %v595_v27, %s1338_s16 }
 0x2c0   : > { %v597_v28 = vpop.permute.xlu1 %596 }
 0x2c1   : > { %v600_v29 = vsel %vm589_vm1, %v597_v28, %v583_v22 }
 0x2c2   : > { %607 = vrot.lane.b32.xlu0 %v600_v29, %s1339_s17 }
 0x2c4   : > { %v599_v30 = vpop.permute.xlu1 %598 }
 0x2c5   : > { %v601_v31 = vsel %vm589_vm1, %v599_v30, %v584_v23 }
 0x2c6   : > { %630 = vrot.lane.b32.xlu0 %v600_v29, %s1340_s18  ;;  %609 = vrot.lane.b32.xlu1 %v601_v31, %s1339_s17 }
 0x2ca   : > { %632 = vrot.lane.b32.xlu1 %v601_v31, %s1340_s18 }
 0x334   : > { %v608_v35 = vpop.permute.xlu0 %607 }
 0x335   : > { %v613_v37 = vsel %vm604_vm4, %v608_v35, 0.0 }
 0x336   : > { %v617_v38 = vmul.f32 %v616_v34, %v613_v37 }
 0x338   : > { %v619_v40 = vadd.f32 %v617_v38, %v588_v36  ;;  %v610_v41 = vpop.permute.xlu1 %609  ;;  %v631_v42 = vpop.permute.xlu0 %630 }
 0x339   : > { %v614_v43 = vsel %vm604_vm4, %v610_v41, 0.0  ;;  %v636_v45 = vsel %vm628_vm5, %v631_v42, 0.0 }
 0x33a   : > { %v618_v46 = vmul.f32 %v616_v34, %v614_v43  ;;  %v640_v49 = vmul.f32 %v639_v44, %v636_v45  ;;  %v625_v52 = vadd.f32 %v623_v47, %v619_v40 }
 0x33c   : > { %v620_v48 = vadd.f32 %v618_v46, %v588_v36  ;;  %v633_v50 = vpop.permute.xlu1 %632  ;;  %v642_v58 = vadd.f32 %v640_v49, %v625_v52 }
 0x33d   : > { %v637_v53 = vsel %vm628_vm5, %v633_v50, 0.0 }
 0x33e   : > { %v641_v54 = vmul.f32 %v639_v44, %v637_v53  ;;  %v626_v55 = vadd.f32 %v624_v51, %v620_v48 }
 0x340   : > { %v643_v59 = vadd.f32 %v641_v54, %v626_v55 }
 0x342   : > { %v1251_v60 = vpack.c.bf16 %v643_v59, %v642_v58 }
 0x344   : > { %1252 = vmatprep.subr.bf16.mxu0 %v1251_v60 }
 0x345   : > { %1254 = vmatpush3.bf16.msra.mxu0 %v1251_v60 }
 0x346   : > { %1256 = vmatprep.subr.bf16.mxu0 %v1255_v61 }
 0x348   : > { %1208 = vmatmul.mubr.msk.f32.vlgmr.msra.gmra.mrb[0].mxu0 %vm328_vm0, %v1457_v13  ;;  %v1271_v13 = vpack.c.bf16 %v958_v12, %v957_v11 }
 0x349   : > { %1258 = vmatpush3.bf16.msra.mxu0 %v1255_v61  ;;  %1218 = vmatprep.mubr.msk.f32.mxu0 %vm727_vm6, %v642_v58 }
 0x34a   : > { %1260 = vmatprep.subr.bf16.mxu0 %v1259_v0  ;;  %1272 = vmatprep.subr.bf16.mxu1 %v1271_v13 }
 0x34b   : > { %1274 = vmatpush3.bf16.msra.mxu1 %v1271_v13 }
 0x34d   : > { %1262 = vmatpush3.bf16.msra.mxu0 %v1259_v0  ;;  %v1341_v0 = vmov -1.0  }
 0x34e   : > { %1264 = vmatprep.subr.bf16.mxu0 %v1263_v3 }
 0x350   : > { %1219 = vmatmul.mubr.msk.f32.vlgmr.msra.gmra.mrb[2].mxu0 %vm727_vm6, %v643_v59 }
 0x351   : > { %1266 = vmatpush3.bf16.msra.mxu0 %v1263_v3 }
 0x352   : > { %1268 = vmatprep.subr.bf16.mxu0 %v1267_v8 }
 0x355   : > { %1270 = vmatpush3.bf16.msra.mxu0 %v1267_v8 }
 0x41b   : > { %v1209_v9 = vpop.f32.mrb[0].mxu0 }
 0x41c   : > { %v710_v10 = vpop.f32.mrb[1].mxu0 }
 0x41d   : > { %1229 = vmatprep.mubr.msk.f32.mxu0 %vm727_vm6, %v710_v10 }
 0x41e   : > { %1230 = vmatmul.mubr.msk.f32.vlgmr.msra.gmra.mrb[2].mxu0 %vm727_vm6, %v1209_v9 }
 0x4f1   : > { %v1231_v15 = vpop.f32.mrb[2].mxu0 }
 0x4f2   : > { %v896_v16 = vadd.f32 %v1231_v15, %v1142_v14  ;;  %v881_v17 = vpop.f32.mrb[3].mxu0 }
 0x4f3   : > { %v895_v18 = vadd.f32 %v1142_v14, %v881_v17  ;;  %v1143_v14 = vld [vmem:[%s1528_s6 + $0x2] ss:$0 sm:$0xff] }
 0x4f4   : > { %v898_v19 = vadd.f32 %v896_v16, %v1441_v5 }
 0x4f5   : > { %v897_v20 = vadd.f32 %v895_v18, %v1439_v4 }
 0x4f6   : > { %v902_v21 = vmul.f32 0.70710677, %v898_v19  ;;  %v900_v11 = vmul.f32 0.5, %v898_v19 }
 0x4f7   : > { %v901_v22 = vmul.f32 0.70710677, %v897_v20  ;;  %v899_v9 = vmul.f32 0.5, %v897_v20 }
 0x4f8   : > { %v908_v23 = vand.u32 2147483647, %v902_v21  ;;  %vm904_vm7 = vcmp.ge.f32.partialorder %v902_v21, 0.0 }
 0x4f9   : > { %v907_v24 = vand.u32 2147483647, %v901_v22  ;;  %vm903_vm8 = vcmp.ge.f32.partialorder %v901_v22, 0.0  ;;  %v906_v1 = vsel %vm904_vm7, 1.0, %v1341_v0 }
 0x4fa   : > { %v910_v25 = vmul.f32 0.3275911, %v908_v23  ;;  %v940_v32 = vsub.f32 0.0, %v908_v23  ;;  %v905_v6 = vsel %vm903_vm8, 1.0, %v1341_v0 }
 0x4fb   : > { %v909_v26 = vmul.f32 0.3275911, %v907_v24  ;;  %v939_v35 = vsub.f32 0.0, %v907_v24 }
 0x4fc   : > { %v912_v27 = vadd.f32 1.0, %v910_v25  ;;  %v942_v4 = vmul.f32 %v940_v32, %v908_v23 }
 0x4fd   : > { %v911_v28 = vadd.f32 1.0, %v909_v26  ;;  %v941_v39 = vmul.f32 %v939_v35, %v907_v24 }
 0x4fe   : > { %1302 = vrcp.f32 %v912_v27  ;;  %v945_v42 = vmul.f32 1.442695, %v942_v4 }
 0x4ff   : > { %1304 = vrcp.f32 %v911_v28  ;;  %v943_v45 = vmul.f32 1.442695, %v941_v39 }
 0x500   : > { %1306 = vpow2.f32 %v945_v42 }
 0x501   : > { %1308 = vpow2.f32 %v943_v45 }
 0x508   : > { %v1303_v29 = vpop.eup %1302 }
 0x509   : > { %v1305_v30 = vpop.eup %1304  ;;  %v916_v31 = vmul.f32 %v1303_v29, %v912_v27 }
 0x50a   : > { %v915_v33 = vmul.f32 %v1305_v30, %v911_v28  ;;  %v1307_v58 = vpop.eup %1306 }
 0x50b   : > { %v918_v34 = vsub.f32 2.0, %v916_v31  ;;  %v1309_v60 = vpop.eup %1308 }
 0x50c   : > { %v917_v5 = vsub.f32 2.0, %v915_v33 }
 0x50d   : > { %v920_v36 = vmul.f32 %v1303_v29, %v918_v34 }
 0x50e   : > { %v919_v37 = vmul.f32 %v1305_v30, %v917_v5 }
 0x50f   : > { %v922_v38 = vmul.f32 1.0614054, %v920_v36 }
 0x510   : > { %v921_v40 = vmul.f32 1.0614054, %v919_v37 }
 0x511   : > { %v924_v41 = vadd.f32 -1.4531521, %v922_v38 }
 0x512   : > { %v923_v43 = vadd.f32 -1.4531521, %v921_v40 }
 0x513   : > { %v926_v44 = vmul.f32 %v924_v41, %v920_v36 }
 0x514   : > { %v925_v46 = vmul.f32 %v923_v43, %v919_v37 }
 0x515   : > { %v928_v47 = vadd.f32 1.4214138, %v926_v44 }
 0x516   : > { %v927_v48 = vadd.f32 1.4214138, %v925_v46 }
 0x517   : > { %v930_v49 = vmul.f32 %v928_v47, %v920_v36 }
 0x518   : > { %v929_v50 = vmul.f32 %v927_v48, %v919_v37 }
 0x519   : > { %v932_v51 = vadd.f32 -0.28449672, %v930_v49 }
 0x51a   : > { %v931_v52 = vadd.f32 -0.28449672, %v929_v50 }
 0x51b   : > { %v934_v53 = vmul.f32 %v932_v51, %v920_v36 }
 0x51c   : > { %v933_v54 = vmul.f32 %v931_v52, %v919_v37 }
 0x51d   : > { %v936_v55 = vadd.f32 0.2548296, %v934_v53 }
 0x51e   : > { %v935_v56 = vadd.f32 0.2548296, %v933_v54 }
 0x51f   : > { %v938_v57 = vmul.f32 %v936_v55, %v920_v36 }
 0x520   : > { %v937_v59 = vmul.f32 %v935_v56, %v919_v37 }
 0x521   : > { %v948_v61 = vmul.f32 %v1307_v58, %v938_v57 }
 0x522   : > { %v947_v62 = vmul.f32 %v1309_v60, %v937_v59 }
 0x523   : > { %v950_v63 = vsub.f32 1.0, %v948_v61 }
 0x524   : > { %v949_v2 = vsub.f32 1.0, %v947_v62 }
 0x525   : > { %v952_v3 = vmul.f32 %v950_v63, %v906_v1 }
 0x526   : > { %v951_v7 = vmul.f32 %v949_v2, %v905_v6 }
 0x527   : > { %v954_v8 = vadd.f32 1.0, %v952_v3 }
 0x528   : > { %v953_v10 = vadd.f32 1.0, %v951_v7 }
 0x529   : > { %v956_v13 = vmul.f32 %v954_v8, %v900_v11 }
 0x52a   : > { %v955_v12 = vmul.f32 %v953_v10, %v899_v9 }
 0x52c   : > { %1236 = vmatprep.mubr.msk.f32.mxu1 %vm328_vm0, %v955_v12 }
 0x52d   : > { %1237 = vmatmul.mubr.msk.f32.vlgmr.msra.gmra.mrb[4].mxu1 %vm328_vm0, %v956_v13 }
 0x600   : > { %v1238_v15 = vpop.f32.mrb[4].mxu1 }
 0x601   : > { %v1042_v16 = vadd.f32 %v1238_v15, %v1143_v14  ;;  %v1036_v17 = vpop.f32.mrb[5].mxu1 }
 0x602   : > { %v1037_v18 = vadd.f32 %v1143_v14, %v1036_v17 }
 0x603   : > { %1047 = vst.msk [vmem:[%s319_s10 + $0x8] sm:$0xff] %vm1045_vm9, %v1042_v16 }
 0x604   : > { %1046 = vst.msk [vmem:[%s319_s10] sm:$0xff] %vm1045_vm9, %v1037_v18 }
 0x605 PF: > { %s19_s27 = sadd.s32 1, %s1335_s27  }
 0x606   : > { %p16_p1 = scmp.ge.s32.totalorder %s19_s27, 4  }
 0x608   :  { %18 = sbr.rel (!%p16_p1) target bundleno = 1 (0x1), region = 87 }
 0x60f   :  { %1069 = vsyncpa [#allocation3], 1 }
 0x610   :  { %1071 = vsyncpa [#allocation3 + $0x1], 1 }

</bundles_post_ra>
